<compile_context>
chip_gen: v5e
topology: v5e:2x2
jax: 0.10.0
libtpu: 0.0.40
codegen_flags: <defaults>
</compile_context>

<pallas_src>
import functools
import math

import numpy as np
import jax
import jax.numpy as jnp
from jax.experimental import pallas as pl
from jax.experimental.pallas import tpu as pltpu


# ----------------------------------------------------------------------------
# Init-time glue (positional tables, rotary frequency tables) — plain numpy.
# ----------------------------------------------------------------------------
def _make_axial_pos(h, w):
    h_pos = np.linspace(-1.0, 1.0, h + 1)
    w_pos = np.linspace(-1.0, 1.0, w + 1)
    h_pos = (h_pos[:-1] + h_pos[1:]) / 2
    w_pos = (w_pos[:-1] + w_pos[1:]) / 2
    hh, ww = np.meshgrid(h_pos, w_pos, indexing="ij")
    return np.stack([hh, ww], axis=-1).reshape(h * w, 2)


def _make_axial_pos_final(h, w, d):
    poses = []
    for i in range(d):
        pos_ax = _make_axial_pos(h // 2 ** i, w // 2 ** i)
        pos_rest = np.full((pos_ax.shape[0], 1), (d - i) / d)
        poses.insert(0, np.concatenate([pos_ax, pos_rest], axis=-1))
    return np.concatenate(poses, axis=-2)


def _rope_tables(dim, head_dim, seq_len):
    """Returns:
      cos, sin   : raw (S, 3*hd//8) tables (reference path)
      cosD, sinD : (S, dim) lane-dense tables (per-head cos/sin tiled across
                   heads, padded with 1/0 over the non-rotary tail of each head)
      PD         : (dim, dim) block-diagonal 'rotate-half' matrix so that
                   rope(x) = x * cosD + (x @ PD) * sinD for all heads at once.
    """
    n_freq = head_dim // 8
    log_min, log_max = math.log(math.pi), math.log(10 * math.pi)
    freqs = np.exp(np.linspace(log_min, log_max, n_freq))
    pos = _make_axial_pos_final(32, 32, 6)
    pos = np.repeat(pos, 3, axis=0)                       # repeat_interleave(3, dim=0)
    pos = np.concatenate([np.zeros((1, 3)), pos], axis=0)
    theta = np.concatenate(
        [pos[:, 0:1] * freqs, pos[:, 1:2] * freqs, pos[:, 2:3] * freqs], axis=-1
    )
    cos = np.cos(theta)[:seq_len].astype(np.float32)      # (S, c)
    sin = np.sin(theta)[:seq_len].astype(np.float32)
    c = cos.shape[-1]
    rest = head_dim - 2 * c
    cosF = np.concatenate([cos, cos, np.ones((seq_len, rest), np.float32)], axis=-1)
    sinF = np.concatenate([sin, sin, np.zeros((seq_len, rest), np.float32)], axis=-1)
    P = np.zeros((head_dim, head_dim), np.float32)
    for j in range(c):
        P[c + j, j] = -1.0   # out[:, j]   += -x[:, c+j] * sin
        P[j, c + j] = 1.0    # out[:, c+j] +=  x[:, j]   * sin
    n_heads = dim // head_dim
    cosD = np.tile(cosF, (1, n_heads))                    # (S, dim)
    sinD = np.tile(sinF, (1, n_heads))
    PD = np.kron(np.eye(n_heads, dtype=np.float32), P)    # (dim, dim) block-diag
    return cos, sin, cosD, sinD, PD


# ----------------------------------------------------------------------------
# Stage 1: LayerNorm -> QKV projection -> RoPE (all heads at once), tiled over
# (batch, sequence). Emits per-head bf16 q/k/v with 1/sqrt(hd) folded into q.
# ----------------------------------------------------------------------------
def _ln_qkv_rope_kernel(x_ref, lnw_ref, lnb_ref, wqkv_ref, cos_ref, sin_ref,
                        rotp_ref, q_ref, k_ref, v_ref, *, D, H, hd, scale):
    x = x_ref[0]                                           # (tq, D) f32
    # LayerNorm (eps = 1e-5, biased variance — matches PyTorch nn.LayerNorm).
    mean = jnp.mean(x, axis=-1, keepdims=True)
    xc = x - mean
    var = jnp.mean(xc * xc, axis=-1, keepdims=True)
    y = xc * jax.lax.rsqrt(var + 1e-5) * lnw_ref[...] + lnb_ref[...]

    # QKV projection: bf16 operands on the MXU, f32 accumulation.
    qkv = jnp.dot(y.astype(jnp.bfloat16), wqkv_ref[...],
                  preferred_element_type=jnp.float32)      # (tq, 3D) f32

    q = qkv[:, :D]
    k = qkv[:, D:2 * D]
    v = qkv[:, 2 * D:]

    # RoPE for all heads in one (tq,D)@(D,D) op: x*cos + (x @ P_blockdiag)*sin.
    cosD = cos_ref[...]
    sinD = sin_ref[...]
    P = rotp_ref[...]
    q = q * cosD + jnp.dot(q, P, preferred_element_type=jnp.float32) * sinD
    k = k * cosD + jnp.dot(k, P, preferred_element_type=jnp.float32) * sinD
    q = q * scale                                          # fold 1/sqrt(hd) into q

    # Write per-head (H, tq, hd) layout in bf16 for the attention stage.
    for h in range(H):
        sl = slice(h * hd, (h + 1) * hd)
        q_ref[0, h] = q[:, sl].astype(jnp.bfloat16)
        k_ref[0, h] = k[:, sl].astype(jnp.bfloat16)
        v_ref[0, h] = v[:, sl].astype(jnp.bfloat16)


# ----------------------------------------------------------------------------
# Stage 2: flash attention (online softmax over KV tiles, heads batched) with
# the (zero-initialized) out projection fused into the finalize step.
# ----------------------------------------------------------------------------
def _flash_attn_kernel(q_ref, k_ref, v_ref, wout_ref, o_ref,
                       m_scr, l_scr, acc_scr, *, tq, tk, H):
    qi = pl.program_id(1)
    ki = pl.program_id(2)
    q_start = qi * tq
    k_start = ki * tk

    @pl.when(ki == 0)
    def _init():
        m_scr[...] = jnp.full(m_scr.shape, -jnp.inf, jnp.float32)
        l_scr[...] = jnp.zeros(l_scr.shape, jnp.float32)
        acc_scr[...] = jnp.zeros(acc_scr.shape, jnp.float32)

    # Skip KV tiles that lie entirely above the causal diagonal.
    @pl.when(k_start <= q_start + (tq - 1))
    def _compute():
        q = q_ref[0]                                       # (H, tq, hd) bf16
        k = k_ref[0]                                       # (H, tk, hd) bf16
        v = v_ref[0]                                       # (H, tk, hd) bf16
        s = jnp.einsum("hqd,hkd->hqk", q, k,
                       preferred_element_type=jnp.float32)  # (H, tq, tk) f32
        rows = q_start + jax.lax.broadcasted_iota(jnp.int32, (tq, tk), 0)
        cols = k_start + jax.lax.broadcasted_iota(jnp.int32, (tq, tk), 1)
        s = jnp.where((cols <= rows)[None, :, :], s, -jnp.inf)

        m_prev = m_scr[...]                                # (H, tq, 1)
        m_new = jnp.maximum(m_prev, jnp.max(s, axis=-1, keepdims=True))
        alpha = jnp.exp(m_prev - m_new)
        p = jnp.exp(s - m_new)                             # (H, tq, tk)
        l_scr[...] = alpha * l_scr[...] + jnp.sum(p, axis=-1, keepdims=True)
        acc_scr[...] = alpha * acc_scr[...] + jnp.einsum(
            "hqk,hkd->hqd", p.astype(jnp.bfloat16), v,
            preferred_element_type=jnp.float32)
        m_scr[...] = m_new

    @pl.when(ki == pl.num_programs(2) - 1)
    def _finalize():
        o = acc_scr[...] * pl.reciprocal(l_scr[...], approx=True)   # (H, tq, hd)
        # Merge heads back into a lane-dense (tq, D) tile and fuse the out proj.
        o = jnp.concatenate([o[h] for h in range(H)], axis=-1)      # (tq, D)
        o_ref[0] = jnp.dot(o.astype(jnp.bfloat16), wout_ref[...],
                           preferred_element_type=jnp.float32).astype(o_ref.dtype)


# ----------------------------------------------------------------------------
# Wrapper
# ----------------------------------------------------------------------------
def self_attention_forward(x, lnw, lnb, wqkv, wout, cosD, sinD, rotPD, head_dim,
                           *, tq=None, tk=None):
    B, S, D = x.shape
    hd = head_dim
    H = D // hd
    tq = min(S, 128) if tq is None else tq
    tk = min(S, 128) if tk is None else tk
    assert S % tq == 0 and S % tk == 0

    wqkv_t = wqkv.T.astype(jnp.bfloat16)                   # (D, 3D)
    wout_t = wout.T.astype(jnp.bfloat16)                   # (D, D)
    cosD = cosD.astype(jnp.float32)
    sinD = sinD.astype(jnp.float32)
    rotPD = rotPD.astype(jnp.float32)

    qkv_struct = jax.ShapeDtypeStruct((B, H, S, hd), jnp.bfloat16)

    # Stage 1: LayerNorm + QKV projection + RoPE, tiled over (batch, seq).
    q, k, v = pl.pallas_call(
        functools.partial(_ln_qkv_rope_kernel, D=D, H=H, hd=hd,
                          scale=1.0 / math.sqrt(hd)),
        out_shape=(qkv_struct, qkv_struct, qkv_struct),
        grid_spec=pltpu.PrefetchScalarGridSpec(
            num_scalar_prefetch=0,
            grid=(B, S // tq),
            in_specs=[
                pl.BlockSpec((1, tq, D), lambda b, i: (b, i, 0)),      # x
                pl.BlockSpec((1, D), lambda b, i: (0, 0)),             # ln weight
                pl.BlockSpec((1, D), lambda b, i: (0, 0)),             # ln bias
                pl.BlockSpec((D, 3 * D), lambda b, i: (0, 0)),         # Wqkv^T (bf16)
                pl.BlockSpec((tq, D), lambda b, i: (i, 0)),            # cosD
                pl.BlockSpec((tq, D), lambda b, i: (i, 0)),            # sinD
                pl.BlockSpec((D, D), lambda b, i: (0, 0)),             # rotate-half P
            ],
            out_specs=(
                pl.BlockSpec((1, H, tq, hd), lambda b, i: (b, 0, i, 0)),
                pl.BlockSpec((1, H, tq, hd), lambda b, i: (b, 0, i, 0)),
                pl.BlockSpec((1, H, tq, hd), lambda b, i: (b, 0, i, 0)),
            ),
        ),
        compiler_params=pltpu.CompilerParams(
            dimension_semantics=("parallel", "parallel")),
    )(x, lnw.reshape(1, D), lnb.reshape(1, D), wqkv_t, cosD, sinD, rotPD)

    # Stage 2: flash attention (online softmax over KV tiles) + fused out proj.
    out = pl.pallas_call(
        functools.partial(_flash_attn_kernel, tq=tq, tk=tk, H=H),
        out_shape=jax.ShapeDtypeStruct((B, S, D), x.dtype),
        grid_spec=pltpu.PrefetchScalarGridSpec(
            num_scalar_prefetch=0,
            grid=(B, S // tq, S // tk),
            in_specs=[
                pl.BlockSpec((1, H, tq, hd), lambda b, qi, ki: (b, 0, qi, 0)),
                pl.BlockSpec((1, H, tk, hd), lambda b, qi, ki: (b, 0, ki, 0)),
                pl.BlockSpec((1, H, tk, hd), lambda b, qi, ki: (b, 0, ki, 0)),
                pl.BlockSpec((D, D), lambda b, qi, ki: (0, 0)),        # Wout^T (bf16)
            ],
            out_specs=pl.BlockSpec((1, tq, D), lambda b, qi, ki: (b, qi, 0)),
            scratch_shapes=[
                pltpu.VMEM((H, tq, 1), jnp.float32),   # running max
                pltpu.VMEM((H, tq, 1), jnp.float32),   # running denom
                pltpu.VMEM((H, tq, hd), jnp.float32),  # running weighted sum
            ],
        ),
        compiler_params=pltpu.CompilerParams(
            dimension_semantics=("parallel", "parallel", "arbitrary")),
    )(q, k, v, wout_t)
    return out


# ----------------------------------------------------------------------------
# Pure-JAX reference (mirrors the PyTorch forward, cache=None path)
# ----------------------------------------------------------------------------
def reference_forward(x, lnw, lnb, wqkv, wout, cos, sin, head_dim):
    B, S, D = x.shape
    H = D // head_dim
    mean = x.mean(-1, keepdims=True)
    var = ((x - mean) ** 2).mean(-1, keepdims=True)
    y = (x - mean) / jnp.sqrt(var + 1e-5) * lnw + lnb
    qkv = jnp.einsum("bsd,ed->bse", y, wqkv, precision="highest")
    qkv = qkv.reshape(B, S, 3, H, head_dim)
    q, k, v = qkv[:, :, 0], qkv[:, :, 1], qkv[:, :, 2]     # (B, S, H, hd)
    c = cos.shape[-1]

    def rope(t):
        t1, t2, rest = t[..., :c], t[..., c:2 * c], t[..., 2 * c:]
        co = cos[:S][None, :, None, :]
        si = sin[:S][None, :, None, :]
        return jnp.concatenate([t1 * co - t2 * si, t1 * si + t2 * co, rest], axis=-1)

    q, k = rope(q), rope(k)
    s = jnp.einsum("bqhd,bkhd->bhqk", q, k, precision="highest") / math.sqrt(head_dim)
    mask = jnp.tril(jnp.ones((S, S), bool))
    s = jnp.where(mask, s, -jnp.inf)
    p = jax.nn.softmax(s, axis=-1)
    o = jnp.einsum("bhqk,bkhd->bqhd", p, v, precision="highest").reshape(B, S, D)
    return jnp.einsum("bsd,ed->bse", o, wout, precision="highest")


if __name__ == "__main__":
    B, S, dim, head_dim = 2, 32, 32, 16   # n_heads = dim // head_dim = 2
    tq = tk = 16                          # exercises the multi-tile flash path

    key = jax.random.PRNGKey(0)
    kx, kq, ko = jax.random.split(key, 3)
    x = jax.random.normal(kx, (B, S, dim), jnp.float32)

    # Parameters per __init__: LayerNorm(dim), Linear(dim, 3*dim, bias=False),
    # zero_init(Linear(dim, dim, bias=False)).
    lnw = jnp.ones((dim,), jnp.float32)
    lnb = jnp.zeros((dim,), jnp.float32)
    bound = 1.0 / math.sqrt(dim)
    wqkv = jax.random.uniform(kq, (3 * dim, dim), jnp.float32, -bound, bound)
    wout_zero = jnp.zeros((dim, dim), jnp.float32)         # zero_init per module

    cos, sin, cosD, sinD, PD = _rope_tables(dim, head_dim, S)
    cos, sin = jnp.asarray(cos), jnp.asarray(sin)
    cosD, sinD, PD = jnp.asarray(cosD), jnp.asarray(sinD), jnp.asarray(PD)

    # Faithful module forward (zero-initialized out_proj -> output is zero).
    out = self_attention_forward(x, lnw, lnb, wqkv, wout_zero, cosD, sinD, PD,
                                 head_dim, tq=tq, tk=tk)
    out = jax.block_until_ready(out)
    np.testing.assert_allclose(np.asarray(out), 0.0, atol=0.0)

    # Numeric check of the full path with a non-zero out_proj (bf16 MXU operands
    # + approx reciprocal => slightly looser tolerance than pure f32).
    wout_rand = jax.random.uniform(ko, (dim, dim), jnp.float32, -bound, bound)
    got = jax.block_until_ready(
        self_attention_forward(x, lnw, lnb, wqkv, wout_rand, cosD, sinD, PD,
                               head_dim, tq=tq, tk=tk))
    want = reference_forward(x, lnw, lnb, wqkv, wout_rand, cos, sin, head_dim)
    np.testing.assert_allclose(np.asarray(got), np.asarray(want),
                               atol=3e-2, rtol=3e-2)

    print("KERNEL_OK")
</pallas_src>

<mosaic_0001>
module attributes {stable_mosaic.version = 11 : i64} {
  func.func @_ln_qkv_rope_kernel(%arg0: i32, %arg1: i32, %arg2: memref<1x16x32xf32, #tpu.memory_space<vmem>>, %arg3: memref<1x32xf32, #tpu.memory_space<vmem>>, %arg4: memref<1x32xf32, #tpu.memory_space<vmem>>, %arg5: memref<32x96xbf16, #tpu.memory_space<vmem>>, %arg6: memref<16x32xf32, #tpu.memory_space<vmem>>, %arg7: memref<16x32xf32, #tpu.memory_space<vmem>>, %arg8: memref<32x32xf32, #tpu.memory_space<vmem>>, %arg9: memref<1x2x16x16xbf16, #tpu.memory_space<vmem>>, %arg10: memref<1x2x16x16xbf16, #tpu.memory_space<vmem>>, %arg11: memref<1x2x16x16xbf16, #tpu.memory_space<vmem>>) attributes {dimension_semantics = [#tpu.dimension_semantics<parallel>, #tpu.dimension_semantics<parallel>], iteration_bounds = array<i64: 2, 2>, scalar_prefetch = 0 : i64, scratch_operands = 0 : i64, tpu.core_type = #tpu.core_type<tc>, window_params = [{transform_indices = @transform_0, window_bounds = array<i64: 1, 16, 32>}, {pipeline_mode = #tpu.pipeline_mode<synchronous>, transform_indices = @transform_1, window_bounds = array<i64: 1, 32>}, {pipeline_mode = #tpu.pipeline_mode<synchronous>, transform_indices = @transform_2, window_bounds = array<i64: 1, 32>}, {pipeline_mode = #tpu.pipeline_mode<synchronous>, transform_indices = @transform_3, window_bounds = array<i64: 32, 96>}, {transform_indices = @transform_4, window_bounds = array<i64: 16, 32>}, {transform_indices = @transform_5, window_bounds = array<i64: 16, 32>}, {pipeline_mode = #tpu.pipeline_mode<synchronous>, transform_indices = @transform_6, window_bounds = array<i64: 32, 32>}, {transform_indices = @transform_7, window_bounds = array<i64: 1, 2, 16, 16>}, {transform_indices = @transform_8, window_bounds = array<i64: 1, 2, 16, 16>}, {transform_indices = @transform_9, window_bounds = array<i64: 1, 2, 16, 16>}]} {
    %c0 = arith.constant 0 : index
    %c0_0 = arith.constant 0 : index
    %c0_1 = arith.constant 0 : index
    %0 = vector.load %arg2[%c0, %c0_0, %c0_1] : memref<1x16x32xf32, #tpu.memory_space<vmem>>, vector<1x16x32xf32>
    %1 = vector.shape_cast %0 : vector<1x16x32xf32> to vector<16x32xf32>
    %cst = arith.constant dense<0.000000e+00> : vector<16xf32>
    %2 = vector.multi_reduction <add>, %1, %cst [1] : vector<16x32xf32> to vector<16xf32>
    %3 = vector.shape_cast %2 : vector<16xf32> to vector<16x1xf32>
    %cst_2 = arith.constant 3.200000e+01 : f32
    %4 = vector.broadcast %cst_2 : f32 to vector<16x1xf32>
    %5 = arith.divf %3, %4 : vector<16x1xf32>
    %6 = vector.broadcast %5 : vector<16x1xf32> to vector<16x32xf32>
    %7 = arith.subf %1, %6 : vector<16x32xf32>
    %8 = arith.mulf %7, %7 : vector<16x32xf32>
    %cst_3 = arith.constant dense<0.000000e+00> : vector<16xf32>
    %9 = vector.multi_reduction <add>, %8, %cst_3 [1] : vector<16x32xf32> to vector<16xf32>
    %10 = vector.shape_cast %9 : vector<16xf32> to vector<16x1xf32>
    %cst_4 = arith.constant 3.200000e+01 : f32
    %11 = vector.broadcast %cst_4 : f32 to vector<16x1xf32>
    %12 = arith.divf %10, %11 : vector<16x1xf32>
    %cst_5 = arith.constant 9.99999974E-6 : f32
    %13 = vector.broadcast %cst_5 : f32 to vector<16x1xf32>
    %14 = arith.addf %12, %13 : vector<16x1xf32>
    %15 = math.rsqrt %14 : vector<16x1xf32>
    %16 = vector.broadcast %15 : vector<16x1xf32> to vector<16x32xf32>
    %17 = arith.mulf %7, %16 : vector<16x32xf32>
    %c0_6 = arith.constant 0 : index
    %c0_7 = arith.constant 0 : index
    %18 = vector.load %arg3[%c0_6, %c0_7] : memref<1x32xf32, #tpu.memory_space<vmem>>, vector<1x32xf32>
    %19 = vector.broadcast %18 : vector<1x32xf32> to vector<16x32xf32>
    %20 = arith.mulf %17, %19 : vector<16x32xf32>
    %c0_8 = arith.constant 0 : index
    %c0_9 = arith.constant 0 : index
    %21 = vector.load %arg4[%c0_8, %c0_9] : memref<1x32xf32, #tpu.memory_space<vmem>>, vector<1x32xf32>
    %22 = vector.broadcast %21 : vector<1x32xf32> to vector<16x32xf32>
    %23 = arith.addf %20, %22 : vector<16x32xf32>
    %24 = arith.truncf %23 : vector<16x32xf32> to vector<16x32xbf16>
    %c0_10 = arith.constant 0 : index
    %c0_11 = arith.constant 0 : index
    %25 = vector.load %arg5[%c0_10, %c0_11] : memref<32x96xbf16, #tpu.memory_space<vmem>>, vector<32x96xbf16>
    %cst_12 = arith.constant dense<0.000000e+00> : vector<16x96xf32>
    %26 = tpu.matmul %24, %25, %cst_12 {dimension_numbers = #tpu.dot_dimension_numbers<[1], [0], [0], [1], [0, 0, 1, 1], [], []>} : vector<16x32xbf16>, vector<32x96xbf16>, vector<16x96xf32> -> vector<16x96xf32>
    %27 = vector.extract_strided_slice %26 {offsets = [0, 0], sizes = [16, 32], strides = [1, 1]} : vector<16x96xf32> to vector<16x32xf32>
    %28 = vector.extract_strided_slice %26 {offsets = [0, 32], sizes = [16, 32], strides = [1, 1]} : vector<16x96xf32> to vector<16x32xf32>
    %29 = vector.extract_strided_slice %26 {offsets = [0, 64], sizes = [16, 32], strides = [1, 1]} : vector<16x96xf32> to vector<16x32xf32>
    %c0_13 = arith.constant 0 : index
    %c0_14 = arith.constant 0 : index
    %30 = vector.load %arg6[%c0_13, %c0_14] : memref<16x32xf32, #tpu.memory_space<vmem>>, vector<16x32xf32>
    %c0_15 = arith.constant 0 : index
    %c0_16 = arith.constant 0 : index
    %31 = vector.load %arg7[%c0_15, %c0_16] : memref<16x32xf32, #tpu.memory_space<vmem>>, vector<16x32xf32>
    %c0_17 = arith.constant 0 : index
    %c0_18 = arith.constant 0 : index
    %32 = vector.load %arg8[%c0_17, %c0_18] : memref<32x32xf32, #tpu.memory_space<vmem>>, vector<32x32xf32>
    %33 = arith.mulf %27, %30 : vector<16x32xf32>
    %cst_19 = arith.constant dense<0.000000e+00> : vector<16x32xf32>
    %34 = tpu.matmul %27, %32, %cst_19 {dimension_numbers = #tpu.dot_dimension_numbers<[1], [0], [0], [1], [0, 0, 1, 1], [], []>} : vector<16x32xf32>, vector<32x32xf32>, vector<16x32xf32> -> vector<16x32xf32>
    %35 = arith.mulf %34, %31 : vector<16x32xf32>
    %36 = arith.addf %33, %35 : vector<16x32xf32>
    %37 = arith.mulf %28, %30 : vector<16x32xf32>
    %cst_20 = arith.constant dense<0.000000e+00> : vector<16x32xf32>
    %38 = tpu.matmul %28, %32, %cst_20 {dimension_numbers = #tpu.dot_dimension_numbers<[1], [0], [0], [1], [0, 0, 1, 1], [], []>} : vector<16x32xf32>, vector<32x32xf32>, vector<16x32xf32> -> vector<16x32xf32>
    %39 = arith.mulf %38, %31 : vector<16x32xf32>
    %40 = arith.addf %37, %39 : vector<16x32xf32>
    %cst_21 = arith.constant 2.500000e-01 : f32
    %41 = vector.broadcast %cst_21 : f32 to vector<16x32xf32>
    %42 = arith.mulf %36, %41 : vector<16x32xf32>
    %43 = vector.extract_strided_slice %42 {offsets = [0, 0], sizes = [16, 16], strides = [1, 1]} : vector<16x32xf32> to vector<16x16xf32>
    %44 = arith.truncf %43 : vector<16x16xf32> to vector<16x16xbf16>
    %c0_22 = arith.constant 0 : index
    %c0_23 = arith.constant 0 : index
    %c0_24 = arith.constant 0 : index
    %c0_25 = arith.constant 0 : index
    %45 = vector.load %arg9[%c0_22, %c0_23, %c0_24, %c0_25] : memref<1x2x16x16xbf16, #tpu.memory_space<vmem>>, vector<1x1x16x16xbf16>
    %46 = vector.shape_cast %45 : vector<1x1x16x16xbf16> to vector<16x16xbf16>
    %47 = vector.shape_cast %44 : vector<16x16xbf16> to vector<1x1x16x16xbf16>
    tpu.vector_store %arg9[%c0_22, %c0_23, %c0_24, %c0_25], %47 {strides = array<i32>} : memref<1x2x16x16xbf16, #tpu.memory_space<vmem>>, vector<1x1x16x16xbf16>,
    %48 = vector.extract_strided_slice %40 {offsets = [0, 0], sizes = [16, 16], strides = [1, 1]} : vector<16x32xf32> to vector<16x16xf32>
    %49 = arith.truncf %48 : vector<16x16xf32> to vector<16x16xbf16>
    %c0_26 = arith.constant 0 : index
    %c0_27 = arith.constant 0 : index
    %c0_28 = arith.constant 0 : index
    %c0_29 = arith.constant 0 : index
    %50 = vector.load %arg10[%c0_26, %c0_27, %c0_28, %c0_29] : memref<1x2x16x16xbf16, #tpu.memory_space<vmem>>, vector<1x1x16x16xbf16>
    %51 = vector.shape_cast %50 : vector<1x1x16x16xbf16> to vector<16x16xbf16>
    %52 = vector.shape_cast %49 : vector<16x16xbf16> to vector<1x1x16x16xbf16>
    tpu.vector_store %arg10[%c0_26, %c0_27, %c0_28, %c0_29], %52 {strides = array<i32>} : memref<1x2x16x16xbf16, #tpu.memory_space<vmem>>, vector<1x1x16x16xbf16>,
    %53 = vector.extract_strided_slice %29 {offsets = [0, 0], sizes = [16, 16], strides = [1, 1]} : vector<16x32xf32> to vector<16x16xf32>
    %54 = arith.truncf %53 : vector<16x16xf32> to vector<16x16xbf16>
    %c0_30 = arith.constant 0 : index
    %c0_31 = arith.constant 0 : index
    %c0_32 = arith.constant 0 : index
    %c0_33 = arith.constant 0 : index
    %55 = vector.load %arg11[%c0_30, %c0_31, %c0_32, %c0_33] : memref<1x2x16x16xbf16, #tpu.memory_space<vmem>>, vector<1x1x16x16xbf16>
    %56 = vector.shape_cast %55 : vector<1x1x16x16xbf16> to vector<16x16xbf16>
    %57 = vector.shape_cast %54 : vector<16x16xbf16> to vector<1x1x16x16xbf16>
    tpu.vector_store %arg11[%c0_30, %c0_31, %c0_32, %c0_33], %57 {strides = array<i32>} : memref<1x2x16x16xbf16, #tpu.memory_space<vmem>>, vector<1x1x16x16xbf16>,
    %58 = vector.extract_strided_slice %42 {offsets = [0, 16], sizes = [16, 16], strides = [1, 1]} : vector<16x32xf32> to vector<16x16xf32>
    %59 = arith.truncf %58 : vector<16x16xf32> to vector<16x16xbf16>
    %c0_34 = arith.constant 0 : index
    %c1 = arith.constant 1 : index
    %c0_35 = arith.constant 0 : index
    %c0_36 = arith.constant 0 : index
    %60 = vector.load %arg9[%c0_34, %c1, %c0_35, %c0_36] : memref<1x2x16x16xbf16, #tpu.memory_space<vmem>>, vector<1x1x16x16xbf16>
    %61 = vector.shape_cast %60 : vector<1x1x16x16xbf16> to vector<16x16xbf16>
    %62 = vector.shape_cast %59 : vector<16x16xbf16> to vector<1x1x16x16xbf16>
    tpu.vector_store %arg9[%c0_34, %c1, %c0_35, %c0_36], %62 {strides = array<i32>} : memref<1x2x16x16xbf16, #tpu.memory_space<vmem>>, vector<1x1x16x16xbf16>,
    %63 = vector.extract_strided_slice %40 {offsets = [0, 16], sizes = [16, 16], strides = [1, 1]} : vector<16x32xf32> to vector<16x16xf32>
    %64 = arith.truncf %63 : vector<16x16xf32> to vector<16x16xbf16>
    %c0_37 = arith.constant 0 : index
    %c1_38 = arith.constant 1 : index
    %c0_39 = arith.constant 0 : index
    %c0_40 = arith.constant 0 : index
    %65 = vector.load %arg10[%c0_37, %c1_38, %c0_39, %c0_40] : memref<1x2x16x16xbf16, #tpu.memory_space<vmem>>, vector<1x1x16x16xbf16>
    %66 = vector.shape_cast %65 : vector<1x1x16x16xbf16> to vector<16x16xbf16>
    %67 = vector.shape_cast %64 : vector<16x16xbf16> to vector<1x1x16x16xbf16>
    tpu.vector_store %arg10[%c0_37, %c1_38, %c0_39, %c0_40], %67 {strides = array<i32>} : memref<1x2x16x16xbf16, #tpu.memory_space<vmem>>, vector<1x1x16x16xbf16>,
    %68 = vector.extract_strided_slice %29 {offsets = [0, 16], sizes = [16, 16], strides = [1, 1]} : vector<16x32xf32> to vector<16x16xf32>
    %69 = arith.truncf %68 : vector<16x16xf32> to vector<16x16xbf16>
    %c0_41 = arith.constant 0 : index
    %c1_42 = arith.constant 1 : index
    %c0_43 = arith.constant 0 : index
    %c0_44 = arith.constant 0 : index
    %70 = vector.load %arg11[%c0_41, %c1_42, %c0_43, %c0_44] : memref<1x2x16x16xbf16, #tpu.memory_space<vmem>>, vector<1x1x16x16xbf16>
    %71 = vector.shape_cast %70 : vector<1x1x16x16xbf16> to vector<16x16xbf16>
    %72 = vector.shape_cast %69 : vector<16x16xbf16> to vector<1x1x16x16xbf16>
    tpu.vector_store %arg11[%c0_41, %c1_42, %c0_43, %c0_44], %72 {strides = array<i32>} : memref<1x2x16x16xbf16, #tpu.memory_space<vmem>>, vector<1x1x16x16xbf16>,
    return
  }
  func.func @transform_0(%arg0: i32, %arg1: i32) -> (i32, i32, i32) {
    %c0_i32 = arith.constant 0 : i32
    %c0_i32_0 = arith.constant 0 : i32
    return %arg0, %arg1, %c0_i32 : i32, i32, i32
  }
  func.func @transform_1(%arg0: i32, %arg1: i32) -> (i32, i32) {
    %c0_i32 = arith.constant 0 : i32
    %c0_i32_0 = arith.constant 0 : i32
    %c0_i32_1 = arith.constant 0 : i32
    return %c0_i32, %c0_i32_0 : i32, i32
  }
  func.func @transform_2(%arg0: i32, %arg1: i32) -> (i32, i32) {
    %c0_i32 = arith.constant 0 : i32
    %c0_i32_0 = arith.constant 0 : i32
    %c0_i32_1 = arith.constant 0 : i32
    return %c0_i32, %c0_i32_0 : i32, i32
  }
  func.func @transform_3(%arg0: i32, %arg1: i32) -> (i32, i32) {
    %c0_i32 = arith.constant 0 : i32
    %c0_i32_0 = arith.constant 0 : i32
    %c0_i32_1 = arith.constant 0 : i32
    return %c0_i32, %c0_i32_0 : i32, i32
  }
  func.func @transform_4(%arg0: i32, %arg1: i32) -> (i32, i32) {
    %c0_i32 = arith.constant 0 : i32
    %c0_i32_0 = arith.constant 0 : i32
    return %arg1, %c0_i32 : i32, i32
  }
  func.func @transform_5(%arg0: i32, %arg1: i32) -> (i32, i32) {
    %c0_i32 = arith.constant 0 : i32
    %c0_i32_0 = arith.constant 0 : i32
    return %arg1, %c0_i32 : i32, i32
  }
  func.func @transform_6(%arg0: i32, %arg1: i32) -> (i32, i32) {
    %c0_i32 = arith.constant 0 : i32
    %c0_i32_0 = arith.constant 0 : i32
    %c0_i32_1 = arith.constant 0 : i32
    return %c0_i32, %c0_i32_0 : i32, i32
  }
  func.func @transform_7(%arg0: i32, %arg1: i32) -> (i32, i32, i32, i32) {
    %c0_i32 = arith.constant 0 : i32
    %c0_i32_0 = arith.constant 0 : i32
    %c0_i32_1 = arith.constant 0 : i32
    return %arg0, %c0_i32, %arg1, %c0_i32_0 : i32, i32, i32, i32
  }
  func.func @transform_8(%arg0: i32, %arg1: i32) -> (i32, i32, i32, i32) {
    %c0_i32 = arith.constant 0 : i32
    %c0_i32_0 = arith.constant 0 : i32
    %c0_i32_1 = arith.constant 0 : i32
    return %arg0, %c0_i32, %arg1, %c0_i32_0 : i32, i32, i32, i32
  }
  func.func @transform_9(%arg0: i32, %arg1: i32) -> (i32, i32, i32, i32) {
    %c0_i32 = arith.constant 0 : i32
    %c0_i32_0 = arith.constant 0 : i32
    %c0_i32_1 = arith.constant 0 : i32
    return %arg0, %c0_i32, %arg1, %c0_i32_0 : i32, i32, i32, i32
  }
}

</mosaic_0001>

<bundles_post_ra>
// kernel: tpu_custom_call.1
= control target key start
LH: loop header
LB: loop body
LE: loop exit
PB: predicated region body
PF: predicated region fallthrough
CT: control target
= control target key end

     0   :  { %s2109_s0 = inlined_call_operand.hbm [shape: f32[2,32,32], index: 0, kind: input, shape index: {}]   ;;  %s2110_s1 = inlined_call_operand.hbm [shape: f32[1,32], index: 1, kind: input, shape index: {}]   ;;  %s2111_s2 = inlined_call_operand.vmem [shape: f32[1,32], index: 2, kind: input, shape index: {}]   ;;  %s2112_s3 = inlined_call_operand.hbm [shape: bf16[32,96], index: 3, kind: input, shape index: {}]   ;;  %s2113_s4 = inlined_call_operand.hbm [shape: f32[32,32], index: 4, kind: input, shape index: {}]   ;;  %s2114_s5 = inlined_call_operand.hbm [shape: f32[32,32], index: 5, kind: input, shape index: {}]   ;;  %s2115_s6 = inlined_call_operand.hbm [shape: f32[32,32], index: 6, kind: input, shape index: {}]   ;;  %s2116_s7 = inlined_call_operand.vmem [shape: bf16[2,2,32,16], index: 7, kind: output, shape index: {0}]   ;;  %s2117_s8 = inlined_call_operand.vmem [shape: bf16[2,2,32,16], index: 8, kind: output, shape index: {1}]   ;;  %s2118_s9 = inlined_call_operand.vmem [shape: bf16[2,2,32,16], index: 9, kind: output, shape index: {2}]  }
   0x1   :  { %2133 = sst [smem:[#allocation29_spill]] %s2110_s1 }
   0x2   :  { %2134 = sst [smem:[#allocation30_spill]] %s2111_s2 }
   0x3   :  { %2135 = sst [smem:[#allocation31_spill]] %s2112_s3 }
   0x4   :  { %2136 = sst [smem:[#allocation32_spill]] %s2113_s4 }
   0x5   :  { %2137 = sst [smem:[#allocation33_spill]] %s2114_s5 }
   0x6   :  { %2138 = sst [smem:[#allocation34_spill]] %s2115_s6 }
   0x7   :  { %2139 = sst [smem:[#allocation35_spill]] %s2116_s7 }
   0x8   :  { %2140 = sst [smem:[#allocation36_spill]] %s2117_s8 }
   0x9   :  { %2141 = sst [smem:[#allocation37_spill]] %s2118_s9 }
   0xa   :  { %15 = vsyncpa [#allocation3], 0 }
   0xb   :  { %17 = vsyncpa [#allocation3 + $0x1], 0 }
   0xc   :  { %18 = vsyncpa [#allocation5], 0 }
   0xd   :  { %19 = vsyncpa [#allocation8], 0 }
   0xe   :  { %21 = vsyncpa [#allocation8 + $0x1], 0 }
   0xf   :  { %22 = vsyncpa [#allocation11], 0  ;;  %s1751_s30 = smov 0   ;;  %s1753_s10 = smov 0  }
  0x10   :  { %s1755_s11 = smov 0   ;;  %s1757_s12 = smov 0  }
  0x11   :  { %s1759_s13 = smov 0   ;;  %s1761_s14 = smov 0  }
  0x12   :  { %s1763_s15 = smov 0   ;;  %s1765_s16 = smov 0  }
  0x13   :  { %s1767_s17 = smov 0   ;;  %s1769_s18 = smov 0  }
  0x14   :  { %s1771_s19 = smov 0  }
  0x15 LB: > { %2142 = sst [smem:[#allocation19_spill]] %s1649_s10  ;;  %s1803_s20 = sadd.s32 4294967295, %s1685_s19   ;;  %s1685_s19 = sphi %s1771_s19, %s28_s19   ;;  %s1681_s18 = sphi %s1769_s18, %s2195_s18   ;;  %s1677_s17 = sphi %s1767_s17, %s2194_s17   ;;  %s1673_s16 = sphi %s1765_s16, %s2193_s16   ;;  %s1669_s15 = sphi %s1763_s15, %s2192_s15   ;;  %s1665_s14 = sphi %s1761_s14, %s2191_s14   ;;  %s1661_s13 = sphi %s1759_s13, %s2190_s13   ;;  %s1657_s12 = sphi %s1757_s12, %s2189_s12   ;;  %s1653_s11 = sphi %s1755_s11, %s2187_s11   ;;  %s1649_s10 = sphi %s1753_s10, %s2186_s10   ;;  %s1645_s30 = sphi %s1751_s30, %s2185_s30  }
  0x16   : > { %2143 = sst [smem:[#allocation20_spill]] %s1653_s11  ;;  %p62_p0 = scmp.ne.s32.totalorder %s1661_s13, %s1657_s12 }
  0x17   : > { %2144 = sst [smem:[#allocation21_spill]] %s1669_s15  ;;  %p63_p1 = scmp.eq.s32.totalorder %s1803_s20, 0 }
  0x18   : > { %2145 = sst [smem:[#allocation22_spill]] %s1673_s16  ;;  %p151_p2 = scmp.ne.s32.totalorder %s1649_s10, %s1645_s30 }
  0x19   : > { %2146 = sst [smem:[#allocation23_spill]] %s1803_s20  ;;  %p1186_p3 = scmp.ge.s32.totalorder %s1685_s19, 1 }
  0x1a   : > { %p1811_p4 = por %p63_p1, %p62_p0  ;;  %p1817_p5 = por %p151_p2, %p63_p1 }
  0x1b   : > { %p293_p6 = scmp.lt.s32.totalorder %s1685_s19, 5  ;;  %s2151_s1 = sld [smem:[#allocation29_spill]] }
  0x1c   : > { %s2147_s21 = scalar_select %p1811_p4, 1, 0 }
  0x1d   : > { %s2149_s22 = scalar_select %p1817_p5, 1, 0 }
  0x1e   : > { %2148 = sst [smem:[#allocation24_spill]] %s2147_s21  ;;  %p1825_p7 = pnand %p1186_p3, %p293_p6 }
  0x1f   : > { %2150 = sst [smem:[#allocation25_spill]] %s2149_s22  ;;  %s1687_s27 = smov [#allocation4]  }
  0x20   : > { %s307_s28 = sshll.u32 %s1687_s27, 4  ;;  %p1266_p8 = pneg %p1825_p7  ;;  %s308_s28 = int_to_ptr.vmem [resolvable:$true] %s307_s28 }
  0x21   : > { %s305_s25 = sshll.u32 %s2151_s1, 4  ;;  %s37_s30 = sadd.s32 1, %s1677_s17  ;;  %s306_s25 = int_to_ptr.hbm [resolvable:$true] %s305_s25 }
  0x22   : > { %p1833_p9 = pnand %p1266_p8, %p63_p1  ;;  %p1838_p10 = scmp.ge.s32.totalorder %s37_s30, 2 }
  0x23   : > { %p57_p11 = scmp.eq.s32.totalorder %s1685_s19, 0  ;;  %s138_s23 = sadd.s32 1, %s1653_s11 }
  0x24   : > { %1269 = dma.hbm_to_vmem [thread:$0]  (!%p1833_p9), %s306_s25, 16, %s308_s28, [#allocation5]  }
  0x25   : > { %s2197_s30 = smov (%p1838_p10, %s37_s30), 0  ;;  %p145_p12 = scmp.ne.s32.totalorder %s1653_s11, %s1649_s10 }
  0x26   : > { %2155 = sst [smem:[#allocation26_spill]] %s2197_s30  ;;  %s1852_s24 = ssub.s32 %s1677_s17, %s2197_s30 }
  0x27   : > { %p224_p13 = scmp.eq.s32.totalorder %s1803_s20, 3  ;;  %p136_p0 = scmp.eq.s32.totalorder %s1852_s24, 0 }
  0x28   : > { %p1860_p2 = por %p145_p12, %p57_p11  ;;  %p1289_p3 = scmp.lt.s32.totalorder %s1685_s19, 4 }
  0x29   : > { %s1865_s25 = scalar_select %p136_p0, %s1653_s11, %s138_s23  }
  0x2a   : > { %s373_s28 = sand.u32 1, %s1685_s19   ;;  %s375_s1 = sand.u32 1, %s1653_s11  }
  0x2b   : > { %2157 = sst [smem:[#allocation27_spill]] %s1865_s25  ;;  %s1195_s9 = sshll.u32 %s375_s1, 4 }
  0x2c   : > { %s1244_s8 = sshll.u32 %s1677_s17, 4  ;;  %s2158_s4 = sld [smem:[#allocation32_spill]] }
  0x2d   : > { %s377_s2 = scalar_lea.vmem [#allocation7], %s1195_s9  ;;  %p1878_p6 = pnand %p1289_p3, %p1860_p2 }
  0x2e   : > { %s385_s22 = sshll.u32 %s377_s2, 4  ;;  %s2160_s5 = sld [smem:[#allocation33_spill]]  ;;  %s386_s22 = int_to_ptr.vmem [resolvable:$true] %s385_s22 }
  0x2f   : > { %s1885_s7 = scalar_lea.sflag [#allocation8], %s373_s28  ;;  %s2126_s2 = smov 8  }
  0x30   : > { %s399_s30 = scalar_lea.vmem [#allocation9], %s1195_s9  ;;  %s2161_s3 = sld [smem:[#allocation31_spill]] }
  0x31   : > { %s1895_s27 = sshll.u32 %s399_s30, 4  ;;  %s1690_s23 = smov [#allocation6]   ;;  %s408_s27 = int_to_ptr.vmem [resolvable:$true] %s1895_s27 }
  0x32   : > { %s382_s16 = scalar_lea.hbm %s2158_s4, %s1244_s8  ;;  %s2162_s6 = sld [smem:[#allocation34_spill]] }
  0x33   : > { %s383_s15 = sshll.u32 %s382_s16, 4  ;;  %s2124_s16 = smov 128   ;;  %s384_s15 = int_to_ptr.hbm [resolvable:$true] %s383_s15 }
  0x34   : > { %s404_s1 = scalar_lea.hbm %s2160_s5, %s1244_s8  ;;  %s1691_s30 = smov 64  }
  0x35   : > { %s405_s11 = sshll.u32 %s404_s1, 4  ;;  %s1693_s8 = smov [#allocation10]   ;;  %s1893_s11 = int_to_ptr.hbm [resolvable:$true] %s405_s11 }
  0x36   : > { %1282 = dma.hbm_to_vmem [thread:$0]  (!%p1878_p6), %s384_s15, 256, %s386_s22, %s1885_s7, %s2124_s16, %s2124_s16, %s2126_s2  }
  0x37   : > { %s319_s28 = sshll.u32 %s2161_s3, 4  ;;  %s321_s15 = sshll.u32 %s1690_s23, 4  ;;  %s320_s28 = int_to_ptr.hbm [resolvable:$true] %s319_s28  ;;  %s322_s15 = int_to_ptr.vmem [resolvable:$true] %s321_s15 }
  0x38   : > { %s333_s9 = sshll.u32 %s2162_s6, 4  ;;  %s1692_s16 = smov 4   ;;  %s334_s9 = int_to_ptr.hbm [resolvable:$true] %s333_s9 }
  0x39   : > { %1272 = dma.hbm_to_vmem [thread:$0]  (!%p1833_p9), %s320_s28, 256, %s322_s15, [#allocation5], %s1691_s30, %s1691_s30, %s1692_s16  }
  0x3a   : > { %s335_s25 = sshll.u32 %s1693_s8, 4  ;;  %s2163_s23 = smov 128   ;;  %s336_s25 = int_to_ptr.vmem [resolvable:$true] %s335_s25 }
  0x3b   : > { %1275 = dma.hbm_to_vmem [thread:$0]  (!%p1833_p9), %s334_s9, 512, %s336_s25, [#allocation11], %s2163_s23, %s2163_s23, %s2126_s2  }
  0x3c   : > { %s40_s22 = sadd.s32 1, %s1681_s18  ;;  %s49_s1 = sadd.s32 1, %s1665_s14 }
  0x3d   : > { %s2199_s22 = smov (!%p1838_p10, %s40_s22), %s1681_s18  ;;  %p56_p8 = scmp.ne.s32.totalorder %s1665_s14, %s1661_s13 }
  0x3e   : > { %s349_s16 = sand.u32 1, %s1665_s14   ;;  %p42_p12 = scmp.ge.s32.totalorder %s2199_s22, 2 }
  0x3f   : > { %p1920_p0 = por %p57_p11, %p56_p8  ;;  %p1926_p2 = por %p224_p13, %p56_p8 }
  0x40   : > { %s2201_s22 = smov (%p42_p12, %s2199_s22), 0  ;;  %s1191_s12 = sshll.u32 %s349_s16, 4 }
  0x41   : > { %s2165_s29 = scalar_select %p1926_p2, 1, 0 }
  0x42   : > { %s1192_s15 = sshll.u32 %s1677_s17, 1  ;;  %s44_s9 = ssub.s32 %s1681_s18, %s2201_s22 }
  0x43   : > { %2166 = sst [smem:[#allocation28_spill]] %s2165_s29  ;;  %s46_s30 = sor.u32 %s1852_s24, %s44_s9 }
  0x44   : > { %s1193_s8 = sshll.u32 %s1681_s18, 2  ;;  %p47_p9 = scmp.eq.s32.totalorder %s46_s30, 0 }
  0x45   : > { %s358_s25 = sadd.s32 %s1193_s8, %s1192_s15  ;;  %s353_s3 = scalar_lea.vmem [#allocation2], %s1191_s12 }
  0x46   : > { %s1194_s2 = sshll.u32 %s358_s25, 3  ;;  %s363_s4 = sshll.u32 %s353_s3, 4  ;;  %s364_s4 = int_to_ptr.vmem [resolvable:$true] %s363_s4 }
  0x47   : > { %s1938_s5 = scalar_select %p47_p9, %s1665_s14, %s49_s1  }
  0x48   : > { %s360_s20 = scalar_lea.hbm %s2109_s0, %s1194_s2  ;;  %p1277_p10 = pnand %p1289_p3, %p1920_p0 }
  0x49   : > { %s361_s21 = sshll.u32 %s360_s20, 4  ;;  %s350_s24 = scalar_lea.sflag [#allocation3], %s349_s16  ;;  %s362_s21 = int_to_ptr.hbm [resolvable:$true] %s361_s21 }
  0x4a   : > { %s2167_s9 = smov 8   ;;  %419 = sbr.rel (%p1825_p7) target bundleno = 978 (0x3d2), region = 48 }
  0x4b   : > { %1279 = dma.hbm_to_vmem [thread:$0]  (!%p1277_p10), %s362_s21, 256, %s364_s4, %s350_s24, %s2163_s23, %s2163_s23, %s2167_s9  }
  0x4c   : > { %1285 = dma.hbm_to_vmem [thread:$0]  (!%p1878_p6), %s1893_s11, 256, %s408_s27, %s1885_s7, %s2163_s23, %s2163_s23, %s2167_s9  }
  0x4d   : > { %s421_s6 = sand.u32 (!%p1825_p7), 1, %s1661_s13  }
  0x4e   : > { %s1961_s20 = sshll.u32 (!%p1825_p7), %s421_s6, 4  ;;  %s422_s2 = scalar_lea.sflag (!%p1825_p7), [#allocation3], %s421_s6 }
  0x4f   : > { %s425_s1 = scalar_lea.vmem [#allocation2], %s1961_s20 }
  0x50   : > { %1628 = dma.done.wait (%p1811_p4), %s422_s2, 256  }
  0x51   : > { %1630 = vsyncadd (%p1811_p4), %s422_s2, 4294967040  ;;  %s2169_s4 = sld [smem:[#allocation23_spill]] }
  0x52   : > { %1632 = dma.done.wait (%p63_p1), [#allocation5], 272  }
  0x53   : > { %1634 = vsyncadd (%p63_p1), [#allocation5], 4294967024  ;;  %s2170_s10 = sld [smem:[#allocation19_spill]] }
  0x57   : > { %s441_s21 = sand.u32 1, %s2169_s4  }
  0x58   : > { %s442_s27 = scalar_lea.sflag [#allocation8], %s441_s21 }
  0x59   : > { %s443_s26 = sand.u32 1, %s2170_s10  }
  0x5a   : > { %s1974_s7 = sshll.u32 %s443_s26, 4 }
  0x5b   : > { %s445_s23 = scalar_lea.vmem [#allocation7], %s1974_s7 }
  0x5c   : > { %1636 = dma.done.wait (%p1817_p5), %s442_s27, 512  }
  0x5d   : > { %1638 = vsyncadd (%p1817_p5), %s442_s27, 4294966784  ;;  %s455_s16 = scalar_lea.vmem [#allocation9], %s1974_s7 }
  0x5e   : > { %1640 = dma.done.wait (%p63_p1), [#allocation11], 512  }
  0x5f   : > { %1642 = vsyncadd (%p63_p1), [#allocation11], 4294966784  ;;  %vm522_vm0 = vcmask 261120   ;;  %v520_v0 = vld [vmem:[%s425_s1] sm:$0xff]  ;;  %v521_v2 = vld [vmem:[%s425_s1 + $0x8] sm:$0xff]  ;;  %v1694_v4 = vmov 32.0  }
  0x60   : > { %v523_v1 = vsel %vm522_vm0, %v520_v0, 0.0  ;;  %v526_v3 = vsel %vm522_vm0, %v521_v2, 0.0  ;;  %1397 = vrcp.f32 %v1694_v4  ;;  %v1247_v21 = vld [vmem:[#allocation6 + $0x8] sm:$0xff]  ;;  %v1246_v23 = vld [vmem:[#allocation6] sm:$0xff]  ;;  %s1695_s28 = smov 32   ;;  %v625_v32 = vld [vmem:[#allocation10 + $0x8] sm:$0xff] }
  0x61   : > { %524 = vadd.xlane.f32.xlu0 %v523_v1  ;;  %612 = vmatpush.bf16.msra.mxu0 %v1247_v21  ;;  %v1992_v26 = vld [vmem:[%s445_s23] sm:$0xff]  ;;  %v1996_v27 = vld [vmem:[%s445_s23 + $0x8] sm:$0xff]  ;;  %s2172_s15 = sld [smem:[#allocation30_spill]]  ;;  %s1696_s30 = smov 96   ;;  %vm720_vm8 = vcmask 125952  }
  0x62   : > { %v627_v28 = vld [vmem:[#allocation10 + $0x18] sm:$0xff]  ;;  %v626_v30 = vld [vmem:[#allocation10 + $0x10] sm:$0xff]  ;;  %v1395_v47 = vld [vmem:[#allocation4] ss:$0 sm:$0xff]  ;;  %s1697_s8 = smov 64   ;;  %s2016_s25 = scalar_lea.vmem [#allocation14], %s1961_s20 }
  0x63   : > { %648 = vmatpush.msra.mxu1 %v627_v28  ;;  %693 = vmatpush.msra.mxu2 %v627_v28  ;;  %v624_v57 = vld [vmem:[#allocation10] sm:$0xff]  ;;  %s1698_s24 = smov 112   ;;  %s2025_s9 = scalar_lea.vmem [#allocation12], %s1961_s20 }
  0x64   : > { %s1699_s3 = smov 80   ;;  %s1700_s6 = smov 48  }
  0x65   : > { %613 = vmatpush.bf16.msra.mxu0 %v1246_v23  ;;  %649 = vmatpush.msra.mxu1 %v626_v30  ;;  %s506_s2 = scalar_lea.vmem [#allocation13], %s1961_s20  ;;  %s2174_s20 = sld [smem:[#allocation21_spill]] (%p1926_p2) }
  0x66   : > { %v1398_v5 = vpop.eup %1397  ;;  %694 = vmatpush.msra.mxu2 %v626_v30  ;;  %s2175_s4 = sld [smem:[#allocation22_spill]] (%p1926_p2) }
  0x67   : > { %v530_v6 = vmul.f32 32.0, %v1398_v5  ;;  %vm534_vm1 = vweird.f32 %v1398_v5  ;;  %650 = vmatpush.msra.mxu1 %v625_v32  ;;  %v1396_v52 = vld [vmem:[%s2172_s15] ss:$0 sm:$0xff]  ;;  %s2176_s23 = sld [smem:[#allocation35_spill]] (%p1926_p2) }
  0x68   : > { %695 = vmatpush.msra.mxu2 %v625_v32 }
  0x69   : > { %527 = vadd.xlane.f32.xlu0 %v526_v3  ;;  %v531_v7 = vsub.f32 1.0, %v530_v6  ;;  %651 = vmatpush.msra.mxu1 %v624_v57 }
  0x6a   : > { %696 = vmatpush.msra.mxu2 %v624_v57 }
  0x6b   : > { %v532_v8 = vmul.f32 %v1398_v5, %v531_v7  ;;  %v623_v7 = vld [vmem:[%s455_s16 + $0x8] sm:$0xff]  ;;  %s1233_s10 = sshll.u32 (%p1926_p2), %s2174_s20, 1 }
  0x6c   : > { %s1234_s11 = sshll.u32 (%p1926_p2), %s2175_s4, 3 }
  0x6d   : > { %v533_v9 = vadd.f32 %v1398_v5, %v532_v8  ;;  %s793_s21 = sadd.s32 (%p1926_p2), %s1234_s11, %s1233_s10 }
  0x6e   : > { %s1235_s26 = sshll.u32 (%p1926_p2), %s793_s21, 2 }
  0x6f   : > { %v535_v10 = vsel %vm534_vm1, %v1398_v5, %v533_v9 }
  0x7d   : > { %665 = vrot.lane.b32.xlu0 %v1992_v26, %s1695_s28 }
  0xd4   : > { %v525_v11 = vpop.xlane.xlu0 %524 }
  0xd5   : > { %v536_v12 = vmul.f32 %v535_v10, %v525_v11 }
  0xd7   : > { %v538_v13 = vsub.f32 %v520_v0, %v536_v12  ;;  %v622_v0 = vld [vmem:[%s455_s16] sm:$0xff]  ;;  %s795_s16 = scalar_lea.vmem (%p1926_p2), %s2176_s23, %s1235_s26 }
  0xd9   : > { %v540_v14 = vmul.f32 %v538_v13, %v538_v13 }
  0xdb   : > { %v542_v15 = vsel %vm522_vm0, %v540_v14, 0.0 }
  0xdc   : > { %543 = vadd.xlane.f32.xlu1 %v542_v15  ;;  %v528_v16 = vpop.xlane.xlu0 %527 }
  0xdd   : > { %v537_v17 = vmul.f32 %v535_v10, %v528_v16 }
  0xdf   : > { %v539_v18 = vsub.f32 %v521_v2, %v537_v17 }
  0xe1   : > { %v541_v19 = vmul.f32 %v539_v18, %v539_v18 }
  0xe3   : > { %v545_v20 = vsel %vm522_vm0, %v541_v19, 0.0 }
  0xe4   : > { %546 = vadd.xlane.f32.xlu1 %v545_v20 }
  0xef   : > { %v666_v20 = vpop.permute.xlu0 %665 }
  0xfd   : > { %667 = vrot.lane.b32.xlu1 %v1996_v27, %s1695_s28 }
 0x14f   : > { %v544_v22 = vpop.xlane.xlu1 %543 }
 0x150   : > { %v548_v24 = vmul.f32 %v544_v22, %v535_v10 }
 0x152   : > { %v550_v25 = vadd.f32 1e-05, %v548_v24 }
 0x154   : > { %1399 = vrsqrt.f32 %v550_v25  ;;  %vm558_vm3 = vweird.f32 %v550_v25 }
 0x157   : > { %v547_v29 = vpop.xlane.xlu1 %546 }
 0x158   : > { %v549_v31 = vmul.f32 %v547_v29, %v535_v10 }
 0x15a   : > { %v1400_v33 = vpop.eup %1399  ;;  %v551_v34 = vadd.f32 1e-05, %v549_v31 }
 0x15b   : > { %v553_v35 = vmul.f32 %v1400_v33, %v550_v25  ;;  %vm559_vm2 = vweird.f32 %v1400_v33 }
 0x15c   : > { %1401 = vrsqrt.f32 %v551_v34  ;;  %vm560_vm4 = vmor %vm558_vm3, %vm559_vm2  ;;  %vm568_vm6 = vweird.f32 %v551_v34 }
 0x15d   : > { %v554_v36 = vmul.f32 %v1400_v33, %v553_v35 }
 0x15f   : > { %v555_v37 = vmul.f32 0.5, %v554_v36 }
 0x161   : > { %v556_v38 = vsub.f32 1.5, %v555_v37 }
 0x162   : > { %v1402_v39 = vpop.eup %1401 }
 0x163   : > { %v557_v40 = vmul.f32 %v1400_v33, %v556_v38  ;;  %v563_v41 = vmul.f32 %v1402_v39, %v551_v34  ;;  %vm569_vm5 = vweird.f32 %v1402_v39 }
 0x164   : > { %vm570_vm7 = vmor %vm568_vm6, %vm569_vm5 }
 0x165   : > { %v564_v42 = vmul.f32 %v1402_v39, %v563_v41  ;;  %v561_v43 = vsel %vm560_vm4, %v1400_v33, %v557_v40 }
 0x166   : > { %v572_v46 = vmul.f32 %v561_v43, %v538_v13 }
 0x167   : > { %v565_v44 = vmul.f32 0.5, %v564_v42 }
 0x168   : > { %v578_v51 = vmul.f32 %v1395_v47, %v572_v46 }
 0x169   : > { %v566_v45 = vsub.f32 1.5, %v565_v44 }
 0x16a   : > { %v584_v54 = vadd.f32 %v1396_v52, %v578_v51 }
 0x16b   : > { %v567_v48 = vmul.f32 %v1402_v39, %v566_v45 }
 0x16d   : > { %v571_v49 = vsel %vm570_vm7, %v1402_v39, %v567_v48 }
 0x16e   : > { %v573_v50 = vmul.f32 %v571_v49, %v539_v18 }
 0x16f   : > { %v668_v63 = vpop.permute.xlu1 %667 }
 0x170   : > { %v579_v53 = vmul.f32 %v1395_v47, %v573_v50 }
 0x172   : > { %v585_v55 = vadd.f32 %v1396_v52, %v579_v53 }
 0x174   : > { %v586_v56 = vpack.c.bf16 %v585_v55, %v584_v54 }
 0x176   : > { %1219 = vmatmul.msk.bf16.vlgmr.msra.gmra.mxu0 %vm522_vm0, %v586_v56 }
 0x1f3   : > { %v615_v58 = vpop.f32.mrf.mxu0 }
 0x1f4   : > { %673 = vrot.lane.b32.xlu2 %v615_v58, %s1696_s30  ;;  %1220 = vmatmul.msk.f32.vlgmr.msra.gmra.mxu1 %vm522_vm0, %v615_v58  ;;  %v628_v3 = vmul.f32 %v1992_v26, %v615_v58  ;;  %v735_v19 = vpack.c.bf16 %v615_v58, %v615_v58  ;;  %v671_v22 = vmul.f32 %v666_v20, %v615_v58 }
 0x1fb   : > { %v617_v59 = vpop.f32.mrf.mxu0 }
 0x1fc   : > { %675 = vrot.lane.b32.xlu2 %v617_v59, %s1696_s30  ;;  %1221 = vmatmul.msk.f32.gmra.mxu1 %vm522_vm0, %v617_v59  ;;  %v736_v60 = vpack.c.bf16 %v617_v59, %v617_v59  ;;  %v629_v10 = vmul.f32 %v1996_v27, %v617_v59  ;;  %v672_v26 = vmul.f32 %v668_v63, %v617_v59 }
 0x1fe   : > { %741 = vrot.lane.b32.xlu1 %v736_v60, %s1697_s8 }
 0x24e   : > { %v674_v61 = vpop.permute.xlu2 %673 }
 0x24f   : > { %1222 = vmatmul.msk.f32.vlgmr.msra.gmra.mxu2 %vm522_vm0, %v674_v61 }
 0x256   : > { %v676_v62 = vpop.permute.xlu2 %675 }
 0x257   : > { %1223 = vmatmul.msk.f32.gmra.mxu2 %vm522_vm0, %v676_v62 }
 0x270   : > { %v742_v1 = vpop.permute.xlu1 %741 }
 0x271   : > { %746 = vst.msk [vmem:[%s2016_s25 + $0x4] sm:$0xf] %vm720_vm8, %v742_v1  ;;  %v653_v2 = vpop.f32.mrf.mxu1 }
 0x272   : > { %v659_v4 = vmul.f32 %v653_v2, %v622_v0 }
 0x274   : > { %v661_v5 = vadd.f32 %v659_v4, %v628_v3 }
 0x276   : > { %v716_v6 = vmul.f32 0.25, %v661_v5 }
 0x278   : > { %v718_v8 = vpack.c.bf16 %v716_v6, %v716_v6 }
 0x279   : > { %v656_v9 = vpop.f32.mrf.mxu1 }
 0x27a   : > { %v660_v11 = vmul.f32 %v656_v9, %v623_v7  ;;  %749 = vrot.lane.b32.xlu0 %v718_v8, %s1698_s24  ;;  %721 = vst.msk [vmem:[%s2025_s9] sm:$0xf] %vm720_vm8, %v718_v8 }
 0x27c   : > { %v662_v12 = vadd.f32 %v660_v11, %v629_v10 }
 0x27e   : > { %v717_v13 = vmul.f32 0.25, %v662_v12 }
 0x280   : > { %v719_v14 = vpack.c.bf16 %v717_v13, %v717_v13 }
 0x282   : > { %722 = vst.msk [vmem:[%s2025_s9 + $0x4] sm:$0xf] %vm720_vm8, %v719_v14 }
 0x289   : > { %v812_v38 = vld [vmem:[%s2025_s9] sm:$0xff] (%p1926_p2)  }
 0x28a   : > { %813 = vst [vmem:[%s795_s16] sm:$0xff] (%p1926_p2), %v812_v38  }
 0x2d2   : > { %v698_v15 = vpop.f32.mrf.mxu2 }
 0x2d3   : > { %v704_v16 = vmul.f32 %v698_v15, %v622_v0 }
 0x2d5   : > { %708 = vrot.lane.b32.xlu2 %v704_v16, %s1695_s28 }
 0x2da   : > { %v701_v17 = vpop.f32.mrf.mxu2 }
 0x2db   : > { %v705_v18 = vmul.f32 %v701_v17, %v623_v7 }
 0x2dd   : > { %710 = vrot.lane.b32.xlu2 %v705_v18, %s1695_s28 }
 0x2e5   : > { %739 = vrot.lane.b32.xlu2 %v735_v19, %s1697_s8 }
 0x2ec   : > { %v750_v21 = vpop.permute.xlu0 %749 }
 0x2ed   : > { %1224 = vst.msk [vmem:[%s2025_s9 + $0x8] sm:$0xf] %vm720_vm8, %v750_v21  ;;  %751 = vrot.lane.b32.xlu2 %v719_v14, %s1698_s24 }
 0x32f   : > { %v709_v23 = vpop.permute.xlu2 %708 }
 0x330   : > { %v714_v24 = vadd.f32 %v709_v23, %v671_v22 }
 0x332   : > { %v723_v25 = vpack.c.bf16 %v714_v24, %v714_v24 }
 0x334   : > { %758 = vrot.lane.b32.xlu1 %v723_v25, %s1699_s3  ;;  %727 = vrot.lane.b32.xlu2 %v723_v25, %s1696_s30 }
 0x337   : > { %v711_v27 = vpop.permute.xlu2 %710 }
 0x338   : > { %v715_v28 = vadd.f32 %v711_v27, %v672_v26 }
 0x33a   : > { %v724_v29 = vpack.c.bf16 %v715_v28, %v715_v28 }
 0x33c   : > { %729 = vrot.lane.b32.xlu0 %v724_v29, %s1696_s30  ;;  %769 = vrot.lane.b32.xlu1 %v736_v60, %s1700_s6 }
 0x33d   : > { %767 = vrot.lane.b32.xlu2 %v735_v19, %s1700_s6 }
 0x33f   : > { %v740_v30 = vpop.permute.xlu2 %739 }
 0x340   : > { %745 = vst.msk [vmem:[%s2016_s25] sm:$0xf] %vm720_vm8, %v740_v30 }
 0x344   : > { %760 = vrot.lane.b32.xlu0 %v724_v29, %s1699_s3 }
 0x347   : > { %v752_v31 = vpop.permute.xlu2 %751 }
 0x348   : > { %1225 = vst.msk [vmem:[%s2025_s9 + $0xc] sm:$0xf] %vm720_vm8, %v752_v31 }
 0x34f   : > { %v816_v39 = vld [vmem:[%s2025_s9 + $0x8] sm:$0xff] (%p1926_p2)  }
 0x350   : > { %817 = vst [vmem:[%s795_s16 + $0x10] sm:$0xff] (%p1926_p2), %v816_v39  }
 0x38e   : > { %v728_v32 = vpop.permute.xlu2 %727 }
 0x38f   : > { %733 = vst.msk [vmem:[%s506_s2] sm:$0xf] %vm720_vm8, %v728_v32 }
 0x397   : > { %v768_v33 = vpop.permute.xlu2 %767 }
 0x398   : > { %1228 = vst.msk [vmem:[%s2016_s25 + $0x8] sm:$0xf] %vm720_vm8, %v768_v33 }
 0x3a6   : > { %v759_v34 = vpop.permute.xlu1 %758 }
 0x3a7   : > { %1226 = vst.msk [vmem:[%s506_s2 + $0x8] sm:$0xf] %vm720_vm8, %v759_v34 }
 0x3ae   : > { %v770_v35 = vpop.permute.xlu1 %769  ;;  %v730_v36 = vpop.permute.xlu0 %729 }
 0x3af   : > { %1229 = vst.msk [vmem:[%s2016_s25 + $0xc] sm:$0xf] %vm720_vm8, %v770_v35 }
 0x3b0   : > { %734 = vst.msk [vmem:[%s506_s2 + $0x4] sm:$0xf] %vm720_vm8, %v730_v36 }
 0x3b3   : > { %790 = sbr.rel (!%p1926_p2) target bundleno = 952 (0x3b8), region = 76 }
 0x3b6   : > { %v761_v37 = vpop.permute.xlu0 %760 }
 0x3b7   : > { %1227 = vst.msk [vmem:[%s506_s2 + $0xc] sm:$0xf] %vm720_vm8, %v761_v37 }
 0x3b8 PF: > { %851 = sbr.rel (!%p1926_p2) target bundleno = 965 (0x3c5), region = 117  ;;  %s2178_s29 = sld [smem:[#allocation21_spill]] (%p1926_p2)  ;;  %v873_v40 = vld [vmem:[%s506_s2] sm:$0xff] (%p1926_p2)  }
 0x3b9   : > { %s2179_s12 = sld [smem:[#allocation22_spill]] (%p1926_p2) }
 0x3ba   : > { %s2180_s6 = sld [smem:[#allocation36_spill]] (%p1926_p2) }
 0x3be   : > { %s1236_s15 = sshll.u32 %s2178_s29, 1  ;;  %v877_v41 = vld [vmem:[%s506_s2 + $0x8] sm:$0xff]  }
 0x3bf   : > { %s1237_s30 = sshll.u32 %s2179_s12, 3 }
 0x3c0   : > { %s854_s8 = sadd.s32 %s1237_s30, %s1236_s15 }
 0x3c1   : > { %s1238_s24 = sshll.u32 %s854_s8, 2 }
 0x3c2   : > { %s856_s1 = scalar_lea.vmem %s2180_s6, %s1238_s24 }
 0x3c3   : > { %874 = vst [vmem:[%s856_s1] sm:$0xff] %v873_v40  }
 0x3c4   : > { %878 = vst [vmem:[%s856_s1 + $0x10] sm:$0xff] %v877_v41  }
 0x3c5 PF: > { %912 = sbr.rel (!%p1926_p2) target bundleno = 978 (0x3d2), region = 158  ;;  %s2182_s4 = sld [smem:[#allocation21_spill]] (%p1926_p2)  ;;  %v934_v42 = vld [vmem:[%s2016_s25] sm:$0xff] (%p1926_p2)   ;;  %v938_v43 = vld [vmem:[%s2016_s25 + $0x8] sm:$0xff] (%p1926_p2)  }
 0x3c6   : > { %s2183_s10 = sld [smem:[#allocation22_spill]] (%p1926_p2) }
 0x3c7   : > { %s2184_s23 = sld [smem:[#allocation37_spill]] (%p1926_p2) }
 0x3cb   : > { %s1239_s11 = sshll.u32 %s2182_s4, 1 }
 0x3cc   : > { %s1240_s21 = sshll.u32 %s2183_s10, 3 }
 0x3cd   : > { %s915_s26 = sadd.s32 %s1240_s21, %s1239_s11 }
 0x3ce   : > { %s1241_s7 = sshll.u32 %s915_s26, 2 }
 0x3cf   : > { %s917_s16 = scalar_lea.vmem %s2184_s23, %s1241_s7 }
 0x3d0   : > { %935 = vst [vmem:[%s917_s16] sm:$0xff] %v934_v42  }
 0x3d1   : > { %939 = vst [vmem:[%s917_s16 + $0x10] sm:$0xff] %v938_v43  }
 0x3d2 PF: > { %s28_s19 = sadd.s32 1, %s1685_s19   ;;  %s2185_s30 = sld [smem:[#allocation19_spill]] }
 0x3d3   : > { %p25_p1 = scmp.ge.s32.totalorder %s28_s19, 6   ;;  %s2186_s10 = sld [smem:[#allocation20_spill]] }
 0x3d4   : > { %s2187_s11 = sld [smem:[#allocation27_spill]]  ;;  %s2189_s12 = smov %s1661_s13 }
 0x3d5   : > { %s2188_s25 = sld [smem:[#allocation26_spill]]  ;;  %s2190_s13 = smov %s1665_s14 }
 0x3d6   : > { %s2191_s14 = smov %s1938_s5  ;;  %s2192_s15 = smov %s1677_s17 }
 0x3d7   : > { %s2193_s16 = smov %s1681_s18  ;;  %s2195_s18 = smov %s2201_s22 }
 0x3d8   :  { %27 = sbr.rel (!%p25_p1) target bundleno = 21 (0x15), region = 274 }
 0x3db   : > { %s2194_s17 = smov %s2188_s25 }
 0x3dd   :  { %997 = vsyncpa [#allocation3], 1 }
 0x3de   :  { %999 = vsyncpa [#allocation3 + $0x1], 1 }
 0x3df   :  { %1000 = vsyncpa [#allocation5], 1 }
 0x3e0   :  { %1001 = vsyncpa [#allocation8], 1 }
 0x3e1   :  { %1003 = vsyncpa [#allocation8 + $0x1], 1 }
 0x3e2   :  { %1004 = vsyncpa [#allocation11], 1 }

</bundles_post_ra>
